<compile_context>
chip_gen: v7x
topology: tpu7x:2x2x1
jax: 0.10.0
libtpu: 0.0.40
codegen_flags: <defaults>
</compile_context>

<pallas_src>
import functools

import jax
import jax.numpy as jnp
from jax import lax
from jax.experimental import pallas as pl
from jax.experimental.pallas import tpu as pltpu

P = 128          # lane pad width: every layer's in/out features padded to 128
N_LAYERS = 6     # 3 shared layers + 3 fused (actor|critic) head layers


# ----------------------------------------------------------------------------
# Pallas kernel: 6 chained (TB,128)x(128,128) matmuls, entirely in VMEM.
# Layers 0-2: tanh everywhere (pad lanes stay 0 since tanh(0)=0).
# Layers 3-5: lane-split activation -> tanh on actor lanes, relu on critic/pad.
# ----------------------------------------------------------------------------
def actor_critic_kernel(x_ref, w_ref, b_ref, out_ref, *, tanh_bounds):
    h = x_ref[...]                          # (TB, P) f32, pad lanes are zero
    bias = b_ref[...]                       # (N_LAYERS, P)
    lane = lax.broadcasted_iota(jnp.int32, (1, P), 1)
    for l, bound in enumerate(tanh_bounds):
        z = jnp.dot(h, w_ref[l], preferred_element_type=jnp.float32)
        z = z + bias[l:l + 1, :]
        if bound >= P:
            h = jnp.tanh(z)                 # shared trunk layer
        else:
            # actor lanes (< bound): tanh ; critic + pad lanes: relu (relu(0)=0)
            h = jnp.where(lane < bound, jnp.tanh(z), jnp.maximum(z, 0.0))
    out_ref[...] = h.astype(out_ref.dtype)  # single lane-dense (TB,128) store


# ----------------------------------------------------------------------------
# Wrapper
# ----------------------------------------------------------------------------
@functools.partial(jax.jit, static_argnames=("actor_hidden", "out_a", "out_c"))
def actor_critic_forward(x, w_packed, b_packed, *, actor_hidden, out_a, out_c):
    B, d_in = x.shape
    x_pad = jnp.pad(x, ((0, 0), (0, P - d_in)))     # lane-dense input slab

    # Batch grid: single block at small B; 256-row tiles for big batches so
    # v7x's two TensorCores can split the "parallel" axis.
    if B > 256 and B % 256 == 0:
        tb = 256
    else:
        tb = B
    grid = (B // tb,)

    # Activation lane boundaries per layer: full-width tanh for the trunk,
    # actor lanes [0, actor_hidden) / [0, out_a) tanh + rest relu for the heads.
    tanh_bounds = (P, P, P, actor_hidden, actor_hidden, out_a)

    cost = pl.CostEstimate(
        flops=2 * B * P * P * N_LAYERS,
        transcendentals=B * P * N_LAYERS,
        bytes_accessed=4 * (2 * B * P + N_LAYERS * P * P + N_LAYERS * P),
    )

    out = pl.pallas_call(
        functools.partial(actor_critic_kernel, tanh_bounds=tanh_bounds),
        out_shape=jax.ShapeDtypeStruct((B, P), jnp.float32),
        grid=grid,
        in_specs=[
            pl.BlockSpec((tb, P), lambda i: (i, 0)),            # x tile
            pl.BlockSpec((N_LAYERS, P, P), lambda i: (0, 0, 0)),  # weights stay resident
            pl.BlockSpec((N_LAYERS, P), lambda i: (0, 0)),        # biases stay resident
        ],
        out_specs=pl.BlockSpec((tb, P), lambda i: (i, 0)),
        compiler_params=pltpu.CompilerParams(
            dimension_semantics=("parallel",)),
        cost_estimate=cost,
    )(x_pad, w_packed, b_packed)

    actor_mean = out[:, :out_a]
    critic = out[:, out_a:out_a + out_c]
    return actor_mean, critic


# ----------------------------------------------------------------------------
# Deterministic parameter init (PyTorch nn.Linear default: U(-1/sqrt(fan_in), +))
# Weights stored transposed: shape (in, out).  Biases stored as (1, out).
# ----------------------------------------------------------------------------
def init_params(key, hp):
    dims = [
        ("s0", hp["input_dim"],      hp["shared_hidden0"]),
        ("s1", hp["shared_hidden0"], hp["shared_hidden1"]),
        ("s2", hp["shared_hidden1"], hp["shared_hidden2"]),
        ("a0", hp["shared_hidden2"], hp["actor_hidden"]),
        ("a1", hp["actor_hidden"],   hp["actor_hidden"]),
        ("a2", hp["actor_hidden"],   hp["output_dim_actor"]),
        ("c0", hp["shared_hidden2"], hp["critic_hidden"]),
        ("c1", hp["critic_hidden"],  hp["critic_hidden"]),
        ("c2", hp["critic_hidden"],  hp["output_dim_critic"]),
    ]
    params = {}
    for name, fan_in, fan_out in dims:
        key, kw, kb = jax.random.split(key, 3)
        bound = 1.0 / jnp.sqrt(jnp.float32(fan_in))
        params[name[0] + "w" + name[1]] = jax.random.uniform(
            kw, (fan_in, fan_out), jnp.float32, -bound, bound)
        params[name[0] + "b" + name[1]] = jax.random.uniform(
            kb, (1, fan_out), jnp.float32, -bound, bound)
    return params


# ----------------------------------------------------------------------------
# Pack the 18 per-layer tensors into two zero-padded slabs:
#   W : (6, 128, 128)  layer l's (in,out) weight at rows/cols described below
#   B : (6, 128)       layer l's bias in the matching lanes
# Head layers are fused: layer 3 = [aw0 | cw0], layers 4/5 = block-diagonal.
# ----------------------------------------------------------------------------
def pack_params(p, hp):
    Din = hp["input_dim"]
    H0, H1, H2 = hp["shared_hidden0"], hp["shared_hidden1"], hp["shared_hidden2"]
    Ha, Hc = hp["actor_hidden"], hp["critic_hidden"]
    Oa, Oc = hp["output_dim_actor"], hp["output_dim_critic"]
    assert max(Din, H0, H1, H2) <= P and Ha + Hc <= P and Oa + Oc <= P

    W = jnp.zeros((N_LAYERS, P, P), jnp.float32)
    Bv = jnp.zeros((N_LAYERS, P), jnp.float32)

    def put_w(W, l, r0, c0, w):
        return W.at[l, r0:r0 + w.shape[0], c0:c0 + w.shape[1]].set(w)

    def put_b(Bv, l, c0, b):
        b = b.reshape(-1)
        return Bv.at[l, c0:c0 + b.shape[0]].set(b)

    # shared trunk
    W = put_w(W, 0, 0, 0, p["sw0"]); Bv = put_b(Bv, 0, 0, p["sb0"])
    W = put_w(W, 1, 0, 0, p["sw1"]); Bv = put_b(Bv, 1, 0, p["sb1"])
    W = put_w(W, 2, 0, 0, p["sw2"]); Bv = put_b(Bv, 2, 0, p["sb2"])
    # fused head layer 0: actor cols [0,Ha), critic cols [Ha,Ha+Hc)
    W = put_w(W, 3, 0, 0,  p["aw0"]); Bv = put_b(Bv, 3, 0,  p["ab0"])
    W = put_w(W, 3, 0, Ha, p["cw0"]); Bv = put_b(Bv, 3, Ha, p["cb0"])
    # fused head layer 1: block-diagonal
    W = put_w(W, 4, 0,  0,  p["aw1"]); Bv = put_b(Bv, 4, 0,  p["ab1"])
    W = put_w(W, 4, Ha, Ha, p["cw1"]); Bv = put_b(Bv, 4, Ha, p["cb1"])
    # fused head layer 2: actor cols [0,Oa), critic cols [Oa,Oa+Oc)
    W = put_w(W, 5, 0,  0,  p["aw2"]); Bv = put_b(Bv, 5, 0,  p["ab2"])
    W = put_w(W, 5, Ha, Oa, p["cw2"]); Bv = put_b(Bv, 5, Oa, p["cb2"])
    return W, Bv


# Pure-JAX reference (mirrors the PyTorch forward) for correctness checking.
def reference_forward(x, p):
    lin = lambda v, w, b: v @ w + b
    y = jnp.tanh(lin(x, p["sw0"], p["sb0"]))
    y = jnp.tanh(lin(y, p["sw1"], p["sb1"]))
    y = jnp.tanh(lin(y, p["sw2"], p["sb2"]))
    a = jnp.tanh(lin(y, p["aw0"], p["ab0"]))
    a = jnp.tanh(lin(a, p["aw1"], p["ab1"]))
    actor_mean = jnp.tanh(lin(a, p["aw2"], p["ab2"]))
    c = jax.nn.relu(lin(y, p["cw0"], p["cb0"]))
    c = jax.nn.relu(lin(c, p["cw1"], p["cb1"]))
    critic = jax.nn.relu(lin(c, p["cw2"], p["cb2"]))
    return actor_mean, critic


if __name__ == "__main__":
    hp = dict(
        input_dim=16,
        shared_hidden0=32,
        shared_hidden1=32,
        shared_hidden2=32,
        actor_hidden=32,
        output_dim_actor=8,
        critic_hidden=32,
        output_dim_critic=1,
    )

    key = jax.random.PRNGKey(0)
    key, kx = jax.random.split(key)
    params = init_params(key, hp)
    w_packed, b_packed = pack_params(params, hp)

    batch = 8
    x = jax.random.normal(kx, (batch, hp["input_dim"]), jnp.float32)

    actor_mean, critic = actor_critic_forward(
        x, w_packed, b_packed,
        actor_hidden=hp["actor_hidden"],
        out_a=hp["output_dim_actor"],
        out_c=hp["output_dim_critic"],
    )
    jax.block_until_ready((actor_mean, critic))

    ref_actor, ref_critic = reference_forward(x, params)
    assert actor_mean.shape == (batch, hp["output_dim_actor"])
    assert critic.shape == (batch, hp["output_dim_critic"])
    assert jnp.allclose(actor_mean, ref_actor, atol=1e-5, rtol=1e-5)
    assert jnp.allclose(critic, ref_critic, atol=1e-5, rtol=1e-5)

    print("KERNEL_OK")
</pallas_src>

<mosaic_0001>
module attributes {stable_mosaic.version = 11 : i64} {
  func.func @actor_critic_kernel(%arg0: i32, %arg1: memref<8x128xf32, #tpu.memory_space<vmem>>, %arg2: memref<6x128x128xf32, #tpu.memory_space<vmem>>, %arg3: memref<6x128xf32, #tpu.memory_space<vmem>>, %arg4: memref<8x128xf32, #tpu.memory_space<vmem>>) attributes {dimension_semantics = [#tpu.dimension_semantics<parallel>], iteration_bounds = array<i64: 1>, scalar_prefetch = 0 : i64, scratch_operands = 0 : i64, tpu.core_type = #tpu.core_type<tc>, window_params = [{transform_indices = @transform_0, window_bounds = array<i64: 8, 128>}, {pipeline_mode = #tpu.pipeline_mode<synchronous>, transform_indices = @transform_1, window_bounds = array<i64: 6, 128, 128>}, {pipeline_mode = #tpu.pipeline_mode<synchronous>, transform_indices = @transform_2, window_bounds = array<i64: 6, 128>}, {transform_indices = @transform_3, window_bounds = array<i64: 8, 128>}]} {
    %c0 = arith.constant 0 : index
    %c0_0 = arith.constant 0 : index
    %0 = vector.load %arg1[%c0, %c0_0] : memref<8x128xf32, #tpu.memory_space<vmem>>, vector<8x128xf32>
    %c0_1 = arith.constant 0 : index
    %c0_2 = arith.constant 0 : index
    %1 = vector.load %arg3[%c0_1, %c0_2] : memref<6x128xf32, #tpu.memory_space<vmem>>, vector<6x128xf32>
    %2 = tpu.iota {dimensions = array<i32: 1>} : vector<1x128xi32>
    %c0_3 = arith.constant 0 : index
    %c0_4 = arith.constant 0 : index
    %c0_5 = arith.constant 0 : index
    %3 = vector.load %arg2[%c0_3, %c0_4, %c0_5] : memref<6x128x128xf32, #tpu.memory_space<vmem>>, vector<1x128x128xf32>
    %4 = vector.shape_cast %3 : vector<1x128x128xf32> to vector<128x128xf32>
    %cst = arith.constant dense<0.000000e+00> : vector<8x128xf32>
    %5 = tpu.matmul %0, %4, %cst {dimension_numbers = #tpu.dot_dimension_numbers<[1], [0], [0], [1], [0, 0, 1, 1], [], []>} : vector<8x128xf32>, vector<128x128xf32>, vector<8x128xf32> -> vector<8x128xf32>
    %6 = vector.extract_strided_slice %1 {offsets = [0, 0], sizes = [1, 128], strides = [1, 1]} : vector<6x128xf32> to vector<1x128xf32>
    %7 = vector.broadcast %6 : vector<1x128xf32> to vector<8x128xf32>
    %8 = arith.addf %5, %7 : vector<8x128xf32>
    %9 = math.tanh %8 : vector<8x128xf32>
    %c1 = arith.constant 1 : index
    %c0_6 = arith.constant 0 : index
    %c0_7 = arith.constant 0 : index
    %10 = vector.load %arg2[%c1, %c0_6, %c0_7] : memref<6x128x128xf32, #tpu.memory_space<vmem>>, vector<1x128x128xf32>
    %11 = vector.shape_cast %10 : vector<1x128x128xf32> to vector<128x128xf32>
    %cst_8 = arith.constant dense<0.000000e+00> : vector<8x128xf32>
    %12 = tpu.matmul %9, %11, %cst_8 {dimension_numbers = #tpu.dot_dimension_numbers<[1], [0], [0], [1], [0, 0, 1, 1], [], []>} : vector<8x128xf32>, vector<128x128xf32>, vector<8x128xf32> -> vector<8x128xf32>
    %13 = vector.extract_strided_slice %1 {offsets = [1, 0], sizes = [1, 128], strides = [1, 1]} : vector<6x128xf32> to vector<1x128xf32>
    %14 = vector.broadcast %13 : vector<1x128xf32> to vector<8x128xf32>
    %15 = arith.addf %12, %14 : vector<8x128xf32>
    %16 = math.tanh %15 : vector<8x128xf32>
    %c2 = arith.constant 2 : index
    %c0_9 = arith.constant 0 : index
    %c0_10 = arith.constant 0 : index
    %17 = vector.load %arg2[%c2, %c0_9, %c0_10] : memref<6x128x128xf32, #tpu.memory_space<vmem>>, vector<1x128x128xf32>
    %18 = vector.shape_cast %17 : vector<1x128x128xf32> to vector<128x128xf32>
    %cst_11 = arith.constant dense<0.000000e+00> : vector<8x128xf32>
    %19 = tpu.matmul %16, %18, %cst_11 {dimension_numbers = #tpu.dot_dimension_numbers<[1], [0], [0], [1], [0, 0, 1, 1], [], []>} : vector<8x128xf32>, vector<128x128xf32>, vector<8x128xf32> -> vector<8x128xf32>
    %20 = vector.extract_strided_slice %1 {offsets = [2, 0], sizes = [1, 128], strides = [1, 1]} : vector<6x128xf32> to vector<1x128xf32>
    %21 = vector.broadcast %20 : vector<1x128xf32> to vector<8x128xf32>
    %22 = arith.addf %19, %21 : vector<8x128xf32>
    %23 = math.tanh %22 : vector<8x128xf32>
    %c3 = arith.constant 3 : index
    %c0_12 = arith.constant 0 : index
    %c0_13 = arith.constant 0 : index
    %24 = vector.load %arg2[%c3, %c0_12, %c0_13] : memref<6x128x128xf32, #tpu.memory_space<vmem>>, vector<1x128x128xf32>
    %25 = vector.shape_cast %24 : vector<1x128x128xf32> to vector<128x128xf32>
    %cst_14 = arith.constant dense<0.000000e+00> : vector<8x128xf32>
    %26 = tpu.matmul %23, %25, %cst_14 {dimension_numbers = #tpu.dot_dimension_numbers<[1], [0], [0], [1], [0, 0, 1, 1], [], []>} : vector<8x128xf32>, vector<128x128xf32>, vector<8x128xf32> -> vector<8x128xf32>
    %27 = vector.extract_strided_slice %1 {offsets = [3, 0], sizes = [1, 128], strides = [1, 1]} : vector<6x128xf32> to vector<1x128xf32>
    %28 = vector.broadcast %27 : vector<1x128xf32> to vector<8x128xf32>
    %29 = arith.addf %26, %28 : vector<8x128xf32>
    %c32_i32 = arith.constant 32 : i32
    %30 = vector.broadcast %c32_i32 : i32 to vector<1x128xi32>
    %31 = arith.cmpi slt, %2, %30 : vector<1x128xi32>
    %32 = math.tanh %29 : vector<8x128xf32>
    %cst_15 = arith.constant 0.000000e+00 : f32
    %33 = vector.broadcast %cst_15 : f32 to vector<8x128xf32>
    %34 = arith.maximumf %29, %33 : vector<8x128xf32>
    %35 = vector.shape_cast %31 : vector<1x128xi1> to vector<1x128xi1>
    %36 = vector.broadcast %35 : vector<1x128xi1> to vector<8x128xi1>
    %37 = arith.select %36, %32, %34 : vector<8x128xi1>, vector<8x128xf32>
    %c4 = arith.constant 4 : index
    %c0_16 = arith.constant 0 : index
    %c0_17 = arith.constant 0 : index
    %38 = vector.load %arg2[%c4, %c0_16, %c0_17] : memref<6x128x128xf32, #tpu.memory_space<vmem>>, vector<1x128x128xf32>
    %39 = vector.shape_cast %38 : vector<1x128x128xf32> to vector<128x128xf32>
    %cst_18 = arith.constant dense<0.000000e+00> : vector<8x128xf32>
    %40 = tpu.matmul %37, %39, %cst_18 {dimension_numbers = #tpu.dot_dimension_numbers<[1], [0], [0], [1], [0, 0, 1, 1], [], []>} : vector<8x128xf32>, vector<128x128xf32>, vector<8x128xf32> -> vector<8x128xf32>
    %41 = vector.extract_strided_slice %1 {offsets = [4, 0], sizes = [1, 128], strides = [1, 1]} : vector<6x128xf32> to vector<1x128xf32>
    %42 = vector.broadcast %41 : vector<1x128xf32> to vector<8x128xf32>
    %43 = arith.addf %40, %42 : vector<8x128xf32>
    %c32_i32_19 = arith.constant 32 : i32
    %44 = vector.broadcast %c32_i32_19 : i32 to vector<1x128xi32>
    %45 = arith.cmpi slt, %2, %44 : vector<1x128xi32>
    %46 = math.tanh %43 : vector<8x128xf32>
    %cst_20 = arith.constant 0.000000e+00 : f32
    %47 = vector.broadcast %cst_20 : f32 to vector<8x128xf32>
    %48 = arith.maximumf %43, %47 : vector<8x128xf32>
    %49 = vector.shape_cast %45 : vector<1x128xi1> to vector<1x128xi1>
    %50 = vector.broadcast %49 : vector<1x128xi1> to vector<8x128xi1>
    %51 = arith.select %50, %46, %48 : vector<8x128xi1>, vector<8x128xf32>
    %c5 = arith.constant 5 : index
    %c0_21 = arith.constant 0 : index
    %c0_22 = arith.constant 0 : index
    %52 = vector.load %arg2[%c5, %c0_21, %c0_22] : memref<6x128x128xf32, #tpu.memory_space<vmem>>, vector<1x128x128xf32>
    %53 = vector.shape_cast %52 : vector<1x128x128xf32> to vector<128x128xf32>
    %cst_23 = arith.constant dense<0.000000e+00> : vector<8x128xf32>
    %54 = tpu.matmul %51, %53, %cst_23 {dimension_numbers = #tpu.dot_dimension_numbers<[1], [0], [0], [1], [0, 0, 1, 1], [], []>} : vector<8x128xf32>, vector<128x128xf32>, vector<8x128xf32> -> vector<8x128xf32>
    %55 = vector.extract_strided_slice %1 {offsets = [5, 0], sizes = [1, 128], strides = [1, 1]} : vector<6x128xf32> to vector<1x128xf32>
    %56 = vector.broadcast %55 : vector<1x128xf32> to vector<8x128xf32>
    %57 = arith.addf %54, %56 : vector<8x128xf32>
    %c8_i32 = arith.constant 8 : i32
    %58 = vector.broadcast %c8_i32 : i32 to vector<1x128xi32>
    %59 = arith.cmpi slt, %2, %58 : vector<1x128xi32>
    %60 = math.tanh %57 : vector<8x128xf32>
    %cst_24 = arith.constant 0.000000e+00 : f32
    %61 = vector.broadcast %cst_24 : f32 to vector<8x128xf32>
    %62 = arith.maximumf %57, %61 : vector<8x128xf32>
    %63 = vector.shape_cast %59 : vector<1x128xi1> to vector<1x128xi1>
    %64 = vector.broadcast %63 : vector<1x128xi1> to vector<8x128xi1>
    %65 = arith.select %64, %60, %62 : vector<8x128xi1>, vector<8x128xf32>
    %c0_25 = arith.constant 0 : index
    %c0_26 = arith.constant 0 : index
    %66 = vector.load %arg4[%c0_25, %c0_26] : memref<8x128xf32, #tpu.memory_space<vmem>>, vector<8x128xf32>
    tpu.vector_store %arg4[%c0_25, %c0_26], %65 {strides = array<i32>} : memref<8x128xf32, #tpu.memory_space<vmem>>, vector<8x128xf32>,
    return
  }
  func.func @transform_0(%arg0: i32) -> (i32, i32) {
    %c0_i32 = arith.constant 0 : i32
    %c0_i32_0 = arith.constant 0 : i32
    return %arg0, %c0_i32 : i32, i32
  }
  func.func @transform_1(%arg0: i32) -> (i32, i32, i32) {
    %c0_i32 = arith.constant 0 : i32
    %c0_i32_0 = arith.constant 0 : i32
    %c0_i32_1 = arith.constant 0 : i32
    %c0_i32_2 = arith.constant 0 : i32
    return %c0_i32, %c0_i32_0, %c0_i32_1 : i32, i32, i32
  }
  func.func @transform_2(%arg0: i32) -> (i32, i32) {
    %c0_i32 = arith.constant 0 : i32
    %c0_i32_0 = arith.constant 0 : i32
    %c0_i32_1 = arith.constant 0 : i32
    return %c0_i32, %c0_i32_0 : i32, i32
  }
  func.func @transform_3(%arg0: i32) -> (i32, i32) {
    %c0_i32 = arith.constant 0 : i32
    %c0_i32_0 = arith.constant 0 : i32
    return %arg0, %c0_i32 : i32, i32
  }
}

</mosaic_0001>

<bundles_post_ra>
// kernel: actor_critic_forward.1
= control target key start
LH: loop header
LB: loop body
LE: loop exit
PB: predicated region body
PF: predicated region fallthrough
CT: control target
= control target key end

     0   :  { %8 = vsyncpa [#allocation3], 0  ;;  %s1099_s12 = smov [#allocation2]   ;;  %s1226_s0 = inlined_call_operand.vmem [shape: f32[8,128], index: 0, kind: input, shape index: {}]   ;;  %s1227_s1 = inlined_call_operand.hbm [shape: f32[6,128,128], index: 1, kind: input, shape index: {}]   ;;  %s1228_s2 = inlined_call_operand.vmem [shape: f32[6,128], index: 2, kind: input, shape index: {}]   ;;  %s1229_s3 = inlined_call_operand.vmem [shape: f32[8,128], index: 3, kind: output, shape index: {}]  }
   0x1   :  { %s16_s13 = sshll.u32 %s1099_s12, 4  ;;  %s1075_s16 = scalar_lea.hbm %s1227_s1, 12288  ;;  %s17_s13 = int_to_ptr.vmem [resolvable:$true] %s16_s13 }
   0x2   :  { %p1076_p0 = scmp.ne.s32.totalorder %s1227_s1, %s1075_s16  ;;  %p1079_p1 = scmp.lt.u32.totalorder %s1075_s16, %s1227_s1 }
   0x4   :  { %p1081_p2 = pnand %p1079_p1, %p1076_p0 }
   0x6   :  { %1084 = shalt.err (!%p1081_p2)
}
   0x7   :  { %s1085_s21 = scalar_lea.vmem %s17_s13, 12288  ;;  %p1090_p4 = scmp.lt.s32.totalorder %s17_s13, %s17_s13 }
   0x8   :  { %p1086_p3 = scmp.ne.s32.totalorder %s17_s13, %s1085_s21  ;;  %p1091_p5 = scmp.lt.s32.totalorder %s1085_s21, %s1085_s21 }
   0xa   :  { %p1092_p6 = por %p1091_p5, %p1090_p4 }
   0xc   :  { %p1093_p7 = pnand %p1092_p6, %p1086_p3 }
   0xe   :  { %1096 = shalt.err (!%p1093_p7)
}
   0xf   :  { %s1100_s22 = smov 128   ;;  %s1101_s23 = smov 8  }
  0x10   :  { %22 = dma.hbm_to_vmem [thread:$0]  %s1227_s1, 12288, %s17_s13, [#allocation3], %s1100_s22, %s1100_s22, %s1101_s23  }
  0x11   :  { %1097 = dma.done.wait [#allocation3], 12288  }
  0x12   :  { %1098 = vsyncadd [#allocation3], 4294955008  ;;  %v1102_v0 = vmov 0.0|0.0   ;;  %vm1103_vm0 = vmmov 0   ;;  %v1104_v1 = vmov 0.0   ;;  %v32_v2 = vld [vmem:[#allocation2] sm:$0xff] }
  0x13   :  { %913 = vmatprep.subr.bf16.mxu0 %v1102_v0  ;;  %735 = vmatprep.mubr.msk.f32.mxu0 %vm1103_vm0, %v1104_v1  ;;  %v33_v3 = vld [vmem:[#allocation2 + $0x8] sm:$0xff]  ;;  %v34_v4 = vld [vmem:[#allocation2 + $0x10] sm:$0xff]  ;;  %v35_v6 = vld [vmem:[#allocation2 + $0x18] sm:$0xff] }
  0x14   :  { %937 = vmatprep.subr.bf16.mxu1 %v1102_v0  ;;  %770 = vmatprep.mubr.msk.f32.mxu1 %vm1103_vm0, %v1104_v1  ;;  %v914_v5 = vpack.c.bf16 %v33_v3, %v32_v2  ;;  %v917_v7 = vpack.c.bf16 %v35_v6, %v34_v4  ;;  %v36_v8 = vld [vmem:[#allocation2 + $0x20] sm:$0xff]  ;;  %v37_v9 = vld [vmem:[#allocation2 + $0x28] sm:$0xff]  ;;  %v126_v12 = vld [vmem:[#allocation2 + $0x90] sm:$0xff]  ;;  %v30_v4 = vlaneseq }
  0x15   :  { %v124_v10 = vld [vmem:[#allocation2 + $0x80] sm:$0xff]  ;;  %v125_v11 = vld [vmem:[#allocation2 + $0x88] sm:$0xff]  ;;  %v127_v13 = vld [vmem:[#allocation2 + $0x98] sm:$0xff]  ;;  %v920_v14 = vpack.c.bf16 %v37_v9, %v36_v8 }
  0x16   :  { %915 = vmatpush3.bf16.msra.mxu0 %v914_v5  ;;  %v938_v15 = vpack.c.bf16 %v125_v11, %v124_v10  ;;  %v38_v16 = vld [vmem:[#allocation2 + $0x30] sm:$0xff]  ;;  %v39_v17 = vld [vmem:[#allocation2 + $0x38] sm:$0xff]  ;;  %v941_v18 = vpack.c.bf16 %v127_v13, %v126_v12  ;;  %v128_v19 = vld [vmem:[#allocation2 + $0xa0] sm:$0xff]  ;;  %v1170_v5 = vshrl.u32 %v30_v4, 7 }
  0x17   :  { %916 = vmatprep.subr.bf16.mxu0 %v1102_v0  ;;  %v129_v20 = vld [vmem:[#allocation2 + $0xa8] sm:$0xff]  ;;  %v923_v21 = vpack.c.bf16 %v39_v17, %v38_v16  ;;  %v40_v22 = vld [vmem:[#allocation2 + $0x40] sm:$0xff]  ;;  %v130_v25 = vld [vmem:[#allocation2 + $0xb0] sm:$0xff] }
  0x18   :  { %939 = vmatpush3.bf16.msra.mxu1 %v938_v15  ;;  %v41_v23 = vld [vmem:[#allocation2 + $0x48] sm:$0xff]  ;;  %v944_v24 = vpack.c.bf16 %v129_v20, %v128_v19  ;;  %v131_v26 = vld [vmem:[#allocation2 + $0xb8] sm:$0xff]  ;;  %v42_v28 = vld [vmem:[#allocation2 + $0x50] sm:$0xff]  ;;  %v50_v6 = vsub.s32 0, %v1170_v5 }
  0x19   :  { %940 = vmatprep.subr.bf16.mxu1 %v1102_v0  ;;  %v926_v27 = vpack.c.bf16 %v41_v23, %v40_v22  ;;  %v43_v29 = vld [vmem:[#allocation2 + $0x58] sm:$0xff]  ;;  %v947_v30 = vpack.c.bf16 %v131_v26, %v130_v25  ;;  %v132_v31 = vld [vmem:[#allocation2 + $0xc0] sm:$0xff]  ;;  %v133_v32 = vld [vmem:[#allocation2 + $0xc8] sm:$0xff] }
  0x1a   :  { %918 = vmatpush3.bf16.msra.mxu0 %v917_v7  ;;  %v929_v33 = vpack.c.bf16 %v43_v29, %v42_v28  ;;  %v44_v34 = vld [vmem:[#allocation2 + $0x60] sm:$0xff]  ;;  %v45_v35 = vld [vmem:[#allocation2 + $0x68] sm:$0xff]  ;;  %v950_v36 = vpack.c.bf16 %v133_v32, %v132_v31  ;;  %v46_v38 = vld [vmem:[#allocation2 + $0x70] sm:$0xff] }
  0x1b   :  { %919 = vmatprep.subr.bf16.mxu0 %v1102_v0  ;;  %v932_v37 = vpack.c.bf16 %v45_v35, %v44_v34  ;;  %v47_v39 = vld [vmem:[#allocation2 + $0x78] sm:$0xff]  ;;  %v28_v41 = vld [vmem:[%s1226_s0] sm:$0xff]  ;;  %v134_v42 = vld [vmem:[#allocation2 + $0xd0] sm:$0xff] }
  0x1c   :  { %942 = vmatpush3.bf16.msra.mxu1 %v941_v18  ;;  %v935_v40 = vpack.c.bf16 %v47_v39, %v46_v38  ;;  %v135_v43 = vld [vmem:[#allocation2 + $0xd8] sm:$0xff]  ;;  %v136_v45 = vld [vmem:[#allocation2 + $0xe0] sm:$0xff]  ;;  %v137_v46 = vld [vmem:[#allocation2 + $0xe8] sm:$0xff] }
  0x1d   :  { %943 = vmatprep.subr.bf16.mxu1 %v1102_v0  ;;  %v953_v44 = vpack.c.bf16 %v135_v43, %v134_v42  ;;  %v956_v47 = vpack.c.bf16 %v137_v46, %v136_v45  ;;  %v138_v48 = vld [vmem:[#allocation2 + $0xf0] sm:$0xff]  ;;  %v139_v49 = vld [vmem:[#allocation2 + $0xf8] sm:$0xff]  ;;  %v216_v51 = vld [vmem:[#allocation2 + $0x100] sm:$0xff] }
  0x1e   :  { %921 = vmatpush3.bf16.msra.mxu0 %v920_v14  ;;  %v959_v50 = vpack.c.bf16 %v139_v49, %v138_v48  ;;  %v217_v52 = vld [vmem:[#allocation2 + $0x108] sm:$0xff]  ;;  %v218_v53 = vld [vmem:[#allocation2 + $0x110] sm:$0xff]  ;;  %v219_v55 = vld [vmem:[#allocation2 + $0x118] sm:$0xff] }
  0x1f   :  { %922 = vmatprep.subr.bf16.mxu0 %v1102_v0  ;;  %v962_v54 = vpack.c.bf16 %v217_v52, %v216_v51  ;;  %v965_v56 = vpack.c.bf16 %v219_v55, %v218_v53  ;;  %v220_v57 = vld [vmem:[#allocation2 + $0x120] sm:$0xff]  ;;  %v221_v58 = vld [vmem:[#allocation2 + $0x128] sm:$0xff]  ;;  %v222_v60 = vld [vmem:[#allocation2 + $0x130] sm:$0xff] }
  0x20   :  { %945 = vmatpush3.bf16.msra.mxu1 %v944_v24  ;;  %v968_v59 = vpack.c.bf16 %v221_v58, %v220_v57  ;;  %v223_v61 = vld [vmem:[#allocation2 + $0x138] sm:$0xff]  ;;  %v224_v63 = vld [vmem:[#allocation2 + $0x140] sm:$0xff]  ;;  %v225_v2 = vld [vmem:[#allocation2 + $0x148] sm:$0xff] }
  0x21   :  { %946 = vmatprep.subr.bf16.mxu1 %v1102_v0  ;;  %v971_v62 = vpack.c.bf16 %v223_v61, %v222_v60  ;;  %v974_v3 = vpack.c.bf16 %v225_v2, %v224_v63  ;;  %v1176_v7 = vld [vmem:[%s1228_s2] sm:$0x3f]  ;;  %v226_v13 = vld [vmem:[#allocation2 + $0x150] sm:$0xff]  ;;  %v227_v14 = vld [vmem:[#allocation2 + $0x158] sm:$0xff]  ;;  %v234_v2 = vsub.s32 2, %v1170_v5 }
  0x22   :  { %924 = vmatpush3.bf16.msra.mxu0 %v923_v21  ;;  %v51_v8 = vrot.slane %v1176_v7, %v50_v6  ;;  %v977_v15 = vpack.c.bf16 %v227_v14, %v226_v13  ;;  %v228_v16 = vld [vmem:[#allocation2 + $0x160] sm:$0xff]  ;;  %v229_v17 = vld [vmem:[#allocation2 + $0x168] sm:$0xff]  ;;  %v230_v19 = vld [vmem:[#allocation2 + $0x170] sm:$0xff] }
  0x23   :  { %925 = vmatprep.subr.bf16.mxu0 %v1102_v0  ;;  %v980_v18 = vpack.c.bf16 %v229_v17, %v228_v16  ;;  %v231_v20 = vld [vmem:[#allocation2 + $0x178] sm:$0xff]  ;;  %v308_v22 = vld [vmem:[#allocation2 + $0x180] sm:$0xff]  ;;  %v309_v23 = vld [vmem:[#allocation2 + $0x188] sm:$0xff] }
  0x24   :  { %948 = vmatpush3.bf16.msra.mxu1 %v947_v30  ;;  %v983_v21 = vpack.c.bf16 %v231_v20, %v230_v19  ;;  %v310_v24 = vld [vmem:[#allocation2 + $0x190] sm:$0xff]  ;;  %v986_v25 = vpack.c.bf16 %v309_v23, %v308_v22  ;;  %v311_v26 = vld [vmem:[#allocation2 + $0x198] sm:$0xff]  ;;  %v312_v28 = vld [vmem:[#allocation2 + $0x1a0] sm:$0xff] }
  0x25   :  { %949 = vmatprep.subr.bf16.mxu1 %v1102_v0  ;;  %v313_v29 = vld [vmem:[#allocation2 + $0x1a8] sm:$0xff]  ;;  %v314_v31 = vld [vmem:[#allocation2 + $0x1b0] sm:$0xff]  ;;  %v315_v32 = vld [vmem:[#allocation2 + $0x1b8] sm:$0xff] }
  0x26   :  { %927 = vmatpush3.bf16.msra.mxu0 %v926_v27  ;;  %v989_v27 = vpack.c.bf16 %v311_v26, %v310_v24  ;;  %v992_v30 = vpack.c.bf16 %v313_v29, %v312_v28  ;;  %v316_v34 = vld [vmem:[#allocation2 + $0x1c0] sm:$0xff]  ;;  %v317_v35 = vld [vmem:[#allocation2 + $0x1c8] sm:$0xff]  ;;  %v318_v43 = vld [vmem:[#allocation2 + $0x1d0] sm:$0xff] }
  0x27   :  { %928 = vmatprep.subr.bf16.mxu0 %v1102_v0  ;;  %v320_v46 = vld [vmem:[#allocation2 + $0x1e0] sm:$0xff]  ;;  %v322_v49 = vld [vmem:[#allocation2 + $0x1f0] sm:$0xff]  ;;  %v406_v53 = vld [vmem:[#allocation2 + $0x208] sm:$0xff] }
  0x28   :  { %951 = vmatpush3.bf16.msra.mxu1 %v950_v36  ;;  %v998_v36 = vpack.c.bf16 %v317_v35, %v316_v34  ;;  %v405_v52 = vld [vmem:[#allocation2 + $0x200] sm:$0xff]  ;;  %v411_v61 = vld [vmem:[#allocation2 + $0x230] sm:$0xff]  ;;  %v500_v23 = vld [vmem:[#allocation2 + $0x288] sm:$0xff]  ;;  %v326_v34 = vsub.s32 3, %v1170_v5 }
  0x29   :  { %952 = vmatprep.subr.bf16.mxu1 %v1102_v0  ;;  %v1010_v55 = vpack.c.bf16 %v406_v53, %v405_v52  ;;  %v409_v58 = vld [vmem:[#allocation2 + $0x220] sm:$0xff]  ;;  %v415_v14 = vld [vmem:[#allocation2 + $0x250] sm:$0xff]  ;;  %v502_v26 = vld [vmem:[#allocation2 + $0x298] sm:$0xff] }
  0x2a   :  { %930 = vmatpush3.bf16.msra.mxu0 %v929_v33  ;;  %v995_v33 = vpack.c.bf16 %v315_v32, %v314_v31  ;;  %v417_v17 = vld [vmem:[#allocation2 + $0x260] sm:$0xff]  ;;  %v419_v20 = vld [vmem:[#allocation2 + $0x270] sm:$0xff]  ;;  %v504_v29 = vld [vmem:[#allocation2 + $0x2a8] sm:$0xff]  ;;  %v327_v35 = vrot.slane %v1176_v7, %v326_v34 }
  0x2b   :  { %931 = vmatprep.subr.bf16.mxu0 %v1102_v0  ;;  %v501_v24 = vld [vmem:[#allocation2 + $0x290] sm:$0xff]  ;;  %v503_v28 = vld [vmem:[#allocation2 + $0x2a0] sm:$0xff]  ;;  %v506_v32 = vld [vmem:[#allocation2 + $0x2b8] sm:$0xff] }
  0x2c   :  { %954 = vmatpush3.bf16.msra.mxu1 %v953_v44  ;;  %v319_v44 = vld [vmem:[#allocation2 + $0x1d8] sm:$0xff]  ;;  %v505_v31 = vld [vmem:[#allocation2 + $0x2b0] sm:$0xff] }
  0x2d   :  { %955 = vmatprep.subr.bf16.mxu1 %v1102_v0  ;;  %v1001_v45 = vpack.c.bf16 %v319_v44, %v318_v43  ;;  %v507_v43 = vld [vmem:[#allocation2 + $0x2c0] sm:$0xff]  ;;  %v508_v44 = vld [vmem:[#allocation2 + $0x2c8] sm:$0xff]  ;;  %v514_v52 = vld [vmem:[#allocation2 + $0x2f8] sm:$0xff] }
  0x2e   :  { %933 = vmatpush3.bf16.msra.mxu0 %v932_v37  ;;  %v142_v37 = vsub.s32 1, %v1170_v5 }
  0x2f   :  { %934 = vmatprep.subr.bf16.mxu0 %v1102_v0 }
  0x30   :  { %957 = vmatpush3.bf16.msra.mxu1 %v956_v47  ;;  %v143_v38 = vrot.slane %v1176_v7, %v142_v37  ;;  %v321_v47 = vld [vmem:[#allocation2 + $0x1e8] sm:$0xff] }
  0x31   :  { %958 = vmatprep.subr.bf16.mxu1 %v1102_v0  ;;  %v1004_v48 = vpack.c.bf16 %v321_v47, %v320_v46  ;;  %v509_v46 = vld [vmem:[#allocation2 + $0x2d0] sm:$0xff]  ;;  %v510_v47 = vld [vmem:[#allocation2 + $0x2d8] sm:$0xff] }
  0x32   :  { %936 = vmatpush3.bf16.msra.mxu0 %v935_v40 }
  0x33   :  { %961 = vmatprep.subr.bf16.mxu0 %v1102_v0 }
  0x34   :  { %960 = vmatpush3.bf16.msra.mxu1 %v959_v50  ;;  %v323_v50 = vld [vmem:[#allocation2 + $0x1f8] sm:$0xff] }
  0x35   :  { %736 = vmatmul.mubr.f32.vlgmr.msra.gmra.mrb[0].mxu0 %v28_v41  ;;  %985 = vmatprep.subr.bf16.mxu1 %v1102_v0  ;;  %v1007_v51 = vpack.c.bf16 %v323_v50, %v322_v49  ;;  %v511_v49 = vld [vmem:[#allocation2 + $0x2e0] sm:$0xff]  ;;  %v512_v50 = vld [vmem:[#allocation2 + $0x2e8] sm:$0xff] }
  0x36   :  { %805 = vmatprep.mubr.msk.f32.mxu0 %vm1103_vm0, %v1104_v1  ;;  %963 = vmatpush3.bf16.msra.mxu0 %v962_v54  ;;  %v407_v54 = vld [vmem:[#allocation2 + $0x210] sm:$0xff] }
  0x37   :  { %964 = vmatprep.subr.bf16.mxu0 %v1102_v0 }
  0x3a   :  { %966 = vmatpush3.bf16.msra.mxu0 %v965_v56  ;;  %v408_v56 = vld [vmem:[#allocation2 + $0x218] sm:$0xff] }
  0x3b   :  { %967 = vmatprep.subr.bf16.mxu0 %v1102_v0  ;;  %v1013_v57 = vpack.c.bf16 %v408_v56, %v407_v54  ;;  %v423_v54 = vsub.s32 4, %v1170_v5 }
  0x3e   :  { %969 = vmatpush3.bf16.msra.mxu0 %v968_v59  ;;  %v410_v59 = vld [vmem:[#allocation2 + $0x228] sm:$0xff] }
  0x3f   :  { %970 = vmatprep.subr.bf16.mxu0 %v1102_v0  ;;  %v1016_v60 = vpack.c.bf16 %v410_v59, %v409_v58 }
  0x42   :  { %972 = vmatpush3.bf16.msra.mxu0 %v971_v62  ;;  %v412_v62 = vld [vmem:[#allocation2 + $0x238] sm:$0xff] }
  0x43   :  { %973 = vmatprep.subr.bf16.mxu0 %v1102_v0  ;;  %v1019_v63 = vpack.c.bf16 %v412_v62, %v411_v61  ;;  %v517_v62 = vsub.s32 5, %v1170_v5 }
  0x46   :  { %975 = vmatpush3.bf16.msra.mxu0 %v974_v3  ;;  %v235_v3 = vrot.slane %v1176_v7, %v234_v2 }
  0x47   :  { %976 = vmatprep.subr.bf16.mxu0 %v1102_v0 }
  0x4a   :  { %978 = vmatpush3.bf16.msra.mxu0 %v977_v15  ;;  %v416_v15 = vld [vmem:[#allocation2 + $0x258] sm:$0xff] }
  0x4b   :  { %979 = vmatprep.subr.bf16.mxu0 %v1102_v0  ;;  %v1025_v16 = vpack.c.bf16 %v416_v15, %v415_v14 }
  0x4e   :  { %981 = vmatpush3.bf16.msra.mxu0 %v980_v18  ;;  %v418_v18 = vld [vmem:[#allocation2 + $0x268] sm:$0xff] }
  0x4f   :  { %982 = vmatprep.subr.bf16.mxu0 %v1102_v0  ;;  %v1028_v19 = vpack.c.bf16 %v418_v18, %v417_v17 }
  0x52   :  { %984 = vmatpush3.bf16.msra.mxu0 %v983_v21  ;;  %v420_v21 = vld [vmem:[#allocation2 + $0x278] sm:$0xff] }
  0x53   :  { %1009 = vmatprep.subr.bf16.mxu0 %v1102_v0  ;;  %v1031_v22 = vpack.c.bf16 %v420_v21, %v419_v20 }
 0x108   :  { %v118_v9 = vpop.f32.mrb[0].mxu0 }
 0x109   :  { %v119_v10 = vadd.f32 %v118_v9, %v51_v8  ;;  %v737_v11 = vpop.f32.mrb[1].mxu0 }
 0x10a   :  { %v413_v11 = vld [vmem:[#allocation2 + $0x240] sm:$0xff] }
 0x10b   :  { %1063 = vtanh.f32 %v119_v10 }
 0x115   :  { %v1064_v12 = vpop.eup %1063 }
 0x116   :  { %771 = vmatmul.mubr.f32.vlgmr.msra.gmra.mrb[0].mxu1 %v1064_v12  ;;  %v414_v12 = vld [vmem:[#allocation2 + $0x248] sm:$0xff] }
 0x117   :  { %840 = vmatprep.mubr.msk.f32.mxu1 %vm1103_vm0, %v1104_v1  ;;  %987 = vmatpush3.bf16.msra.mxu1 %v986_v25  ;;  %v1022_v13 = vpack.c.bf16 %v414_v12, %v413_v11 }
 0x118   :  { %988 = vmatprep.subr.bf16.mxu1 %v1102_v0 }
 0x11b   :  { %990 = vmatpush3.bf16.msra.mxu1 %v989_v27  ;;  %v1037_v27 = vpack.c.bf16 %v502_v26, %v501_v24 }
 0x11c   :  { %991 = vmatprep.subr.bf16.mxu1 %v1102_v0 }
 0x11f   :  { %993 = vmatpush3.bf16.msra.mxu1 %v992_v30  ;;  %v1040_v30 = vpack.c.bf16 %v504_v29, %v503_v28 }
 0x120   :  { %994 = vmatprep.subr.bf16.mxu1 %v1102_v0 }
 0x123   :  { %996 = vmatpush3.bf16.msra.mxu1 %v995_v33  ;;  %v1043_v33 = vpack.c.bf16 %v506_v32, %v505_v31 }
 0x124   :  { %997 = vmatprep.subr.bf16.mxu1 %v1102_v0 }
 0x127   :  { %999 = vmatpush3.bf16.msra.mxu1 %v998_v36 }
 0x128   :  { %1000 = vmatprep.subr.bf16.mxu1 %v1102_v0 }
 0x12b   :  { %1002 = vmatpush3.bf16.msra.mxu1 %v1001_v45  ;;  %v1046_v45 = vpack.c.bf16 %v508_v44, %v507_v43 }
 0x12c   :  { %1003 = vmatprep.subr.bf16.mxu1 %v1102_v0 }
 0x12f   :  { %1005 = vmatpush3.bf16.msra.mxu1 %v1004_v48  ;;  %v1049_v48 = vpack.c.bf16 %v510_v47, %v509_v46 }
 0x130   :  { %1006 = vmatprep.subr.bf16.mxu1 %v1102_v0 }
 0x133   :  { %1008 = vmatpush3.bf16.msra.mxu1 %v1007_v51  ;;  %v1052_v51 = vpack.c.bf16 %v512_v50, %v511_v49 }
 0x134   :  { %1033 = vmatprep.subr.bf16.mxu1 %v1102_v0 }
 0x1e9   :  { %v210_v39 = vpop.f32.mrb[0].mxu1 }
 0x1ea   :  { %v211_v40 = vadd.f32 %v210_v39, %v143_v38  ;;  %v772_v41 = vpop.f32.mrb[1].mxu1  ;;  %v31_v39 = vand.u32 127, %v30_v4  ;;  %v513_v4 = vld [vmem:[#allocation2 + $0x2f0] sm:$0xff] }
 0x1eb   :  { %v1055_v53 = vpack.c.bf16 %v514_v52, %v513_v4 }
 0x1ec   :  { %1065 = vtanh.f32 %v211_v40  ;;  %vm398_vm1 = vcmp.lt.s32.totalorder %v31_v39, 32  ;;  %vm589_vm2 = vcmp.lt.s32.totalorder %v31_v39, 8 }
 0x1f6   :  { %v1066_v42 = vpop.eup %1065 }
 0x1f7   :  { %806 = vmatmul.mubr.f32.vlgmr.msra.gmra.mrb[2].mxu0 %v1066_v42 }
 0x1f8   :  { %875 = vmatprep.mubr.msk.f32.mxu0 %vm1103_vm0, %v1104_v1  ;;  %1011 = vmatpush3.bf16.msra.mxu0 %v1010_v55  ;;  %v424_v55 = vrot.slane %v1176_v7, %v423_v54 }
 0x1f9   :  { %1012 = vmatprep.subr.bf16.mxu0 %v1102_v0 }
 0x1fc   :  { %1014 = vmatpush3.bf16.msra.mxu0 %v1013_v57 }
 0x1fd   :  { %1015 = vmatprep.subr.bf16.mxu0 %v1102_v0 }
 0x200   :  { %1017 = vmatpush3.bf16.msra.mxu0 %v1016_v60 }
 0x201   :  { %1018 = vmatprep.subr.bf16.mxu0 %v1102_v0 }
 0x204   :  { %1020 = vmatpush3.bf16.msra.mxu0 %v1019_v63  ;;  %v518_v63 = vrot.slane %v1176_v7, %v517_v62 }
 0x205   :  { %1021 = vmatprep.subr.bf16.mxu0 %v1102_v0 }
 0x208   :  { %1023 = vmatpush3.bf16.msra.mxu0 %v1022_v13 }
 0x209   :  { %1024 = vmatprep.subr.bf16.mxu0 %v1102_v0 }
 0x20c   :  { %1026 = vmatpush3.bf16.msra.mxu0 %v1025_v16 }
 0x20d   :  { %1027 = vmatprep.subr.bf16.mxu0 %v1102_v0 }
 0x210   :  { %1029 = vmatpush3.bf16.msra.mxu0 %v1028_v19 }
 0x211   :  { %1030 = vmatprep.subr.bf16.mxu0 %v1102_v0 }
 0x214   :  { %1032 = vmatpush3.bf16.msra.mxu0 %v1031_v22 }
 0x2ca   :  { %v302_v6 = vpop.f32.mrb[2].mxu0 }
 0x2cb   :  { %v303_v8 = vadd.f32 %v302_v6, %v235_v3  ;;  %v807_v9 = vpop.f32.mrb[3].mxu0 }
 0x2cd   :  { %1067 = vtanh.f32 %v303_v8 }
 0x2d7   :  { %v1068_v10 = vpop.eup %1067 }
 0x2d8   :  { %841 = vmatmul.mubr.f32.vlgmr.msra.gmra.mrb[2].mxu1 %v1068_v10 }
 0x2d9   :  { %910 = vmatprep.mubr.msk.f32.mxu1 %vm1103_vm0, %v1104_v1  ;;  %v499_v1 = vld [vmem:[#allocation2 + $0x280] sm:$0xff] }
 0x2da   :  { %v1034_v25 = vpack.c.bf16 %v500_v23, %v499_v1 }
 0x2dc   :  { %1035 = vmatpush3.bf16.msra.mxu1 %v1034_v25 }
 0x2dd   :  { %1036 = vmatprep.subr.bf16.mxu1 %v1102_v0 }
 0x2e0   :  { %1038 = vmatpush3.bf16.msra.mxu1 %v1037_v27 }
 0x2e1   :  { %1039 = vmatprep.subr.bf16.mxu1 %v1102_v0 }
 0x2e4   :  { %1041 = vmatpush3.bf16.msra.mxu1 %v1040_v30 }
 0x2e5   :  { %1042 = vmatprep.subr.bf16.mxu1 %v1102_v0 }
 0x2e8   :  { %1044 = vmatpush3.bf16.msra.mxu1 %v1043_v33 }
 0x2e9   :  { %1045 = vmatprep.subr.bf16.mxu1 %v1102_v0 }
 0x2ec   :  { %1047 = vmatpush3.bf16.msra.mxu1 %v1046_v45 }
 0x2ed   :  { %1048 = vmatprep.subr.bf16.mxu1 %v1102_v0 }
 0x2f0   :  { %1050 = vmatpush3.bf16.msra.mxu1 %v1049_v48 }
 0x2f1   :  { %1051 = vmatprep.subr.bf16.mxu1 %v1102_v0 }
 0x2f4   :  { %1053 = vmatpush3.bf16.msra.mxu1 %v1052_v51 }
 0x2f5   :  { %1054 = vmatprep.subr.bf16.mxu1 %v1102_v0 }
 0x2f8   :  { %1056 = vmatpush3.bf16.msra.mxu1 %v1055_v53 }
 0x3ab   :  { %v394_v36 = vpop.f32.mrb[2].mxu1 }
 0x3ac   :  { %v395_v37 = vadd.f32 %v394_v36, %v327_v35  ;;  %v842_v38 = vpop.f32.mrb[3].mxu1 }
 0x3ae   :  { %1069 = vtanh.f32 %v395_v37  ;;  %v400_v40 = vmax.f32 %v395_v37, 0.0 }
 0x3b8   :  { %v1070_v41 = vpop.eup %1069 }
 0x3b9   :  { %v403_v42 = vsel %vm398_vm1, %v1070_v41, %v400_v40 }
 0x3ba   :  { %876 = vmatmul.mubr.f32.vlgmr.msra.gmra.mrb[4].mxu0 %v403_v42 }
 0x48d   :  { %v491_v56 = vpop.f32.mrb[4].mxu0 }
 0x48e   :  { %v492_v57 = vadd.f32 %v491_v56, %v424_v55  ;;  %v877_v58 = vpop.f32.mrb[5].mxu0 }
 0x490   :  { %1071 = vtanh.f32 %v492_v57  ;;  %v496_v59 = vmax.f32 %v492_v57, 0.0 }
 0x49a   :  { %v1072_v60 = vpop.eup %1071 }
 0x49b   :  { %v497_v61 = vsel %vm398_vm1, %v1072_v60, %v496_v59 }
 0x49c   :  { %911 = vmatmul.mubr.f32.vlgmr.msra.gmra.mrb[4].mxu1 %v497_v61 }
 0x56f   :  { %v585_v2 = vpop.f32.mrb[4].mxu1 }
 0x570   :  { %v586_v0 = vadd.f32 %v585_v2, %v518_v63  ;;  %v912_v3 = vpop.f32.mrb[5].mxu1 }
 0x572   :  { %1073 = vtanh.f32 %v586_v0  ;;  %v591_v6 = vmax.f32 %v586_v0, 0.0 }
 0x57c   :  { %v1074_v8 = vpop.eup %1073 }
 0x57d   :  { %v594_v9 = vsel %vm589_vm2, %v1074_v8, %v591_v6 }
 0x57e   :  { %595 = vst [vmem:[%s1229_s3] sm:$0xff] %v594_v9 }
 0x57f   :  { %600 = vsyncpa [#allocation3], 1 }

</bundles_post_ra>
